<compile_context>
chip_gen: v7x
topology: tpu7x:2x2x1
jax: 0.10.0
libtpu: 0.0.40
codegen_flags: <defaults>
</compile_context>

<pallas_src>
import jax
import jax.numpy as jnp
import numpy as np
from jax import lax
from jax.experimental import pallas as pl
from jax.experimental.pallas import tpu as pltpu


def rnn_fused_kernel(tok_ref, proj_ref, whh_ref, fcw_ref, fcb_ref, out_ref):
    """Fused token-gather + tanh-RNN recurrence + final Linear.

    tok_ref : SMEM (seq, batch) int32    token ids (scalar-prefetched)
    proj_ref: VMEM (vocab, 1, hidden)    emb @ W_ih + (b_ih + b_hh), one row/token
    whh_ref : VMEM (hidden, hidden)      recurrent weight (right-multiply layout)
    fcw_ref : VMEM (hidden, out_dim)     final Linear weight
    fcb_ref : VMEM (1, out_dim)          final Linear bias
    out_ref : VMEM (batch, out_dim)      output logits
    """
    seq_len, batch = tok_ref.shape
    hid = whh_ref.shape[0]

    # Hoisted: exactly one vld of W_hh into vregs, reused by every unrolled step.
    whh = whh_ref[...]

    def step(t, h):
        # Per-token row gather from the folded projection table.  Dynamic index
        # on the LEADING axis of a 3-D VMEM ref (well-supported path); batch is
        # a static Python loop (batch=2), so this is just `batch` tiny loads.
        rows = [proj_ref[tok_ref[t, b]] for b in range(batch)]   # each (1, hid)
        xw_t = jnp.concatenate(rows, axis=0)                     # (batch, hid)
        return jnp.tanh(
            xw_t + jnp.dot(h, whh, preferred_element_type=jnp.float32)
        )

    # Partial unroll: full LLO visibility at toy seq_len (8 == full unroll here)
    # without vreg/compile-time blowup if seq_len grows.
    h_final = lax.fori_loop(
        0, seq_len, step,
        jnp.zeros((batch, hid), jnp.float32),
        unroll=min(int(seq_len), 8),
    )

    # Final Linear fused into the same kernel: no extra HBM round trip for h.
    logits = (
        jnp.dot(h_final, fcw_ref[...], preferred_element_type=jnp.float32)
        + fcb_ref[...]
    )
    out_ref[...] = logits.astype(out_ref.dtype)


def rnn_forward(x_tokens, emb_table, w_ih, w_hh, bias, fc_w, fc_b):
    """x_tokens: (seq, batch) int32. Returns (batch, output_dim) float32."""
    seq_len, batch = x_tokens.shape
    hid_dim = w_hh.shape[0]
    out_dim = fc_w.shape[1]
    vocab = emb_table.shape[0]

    # One-time fold of the input projection + biases into the embedding table
    # (row-equivalent to the reference cell equation).
    proj_table = (emb_table @ w_ih + bias).astype(jnp.float32)   # (vocab, hid)
    # (vocab, 1, hid): gathered axis is a leading (non-tiled) axis in the kernel.
    proj3 = proj_table[:, None, :]

    fc_b2 = fc_b.reshape(1, out_dim).astype(jnp.float32)
    w_hh_f = w_hh.astype(jnp.float32)
    fc_w_f = fc_w.astype(jnp.float32)

    # Advisory cost for XLA scheduling around the custom call.
    flops = int(seq_len) * 2 * batch * hid_dim * hid_dim + 2 * batch * hid_dim * out_dim
    transcendentals = int(seq_len) * batch * hid_dim
    bytes_accessed = 4 * (
        x_tokens.size + proj3.size + w_hh_f.size + fc_w_f.size + fc_b2.size
        + batch * out_dim
    )
    cost = pl.CostEstimate(
        flops=flops, transcendentals=transcendentals, bytes_accessed=bytes_accessed
    )

    grid_spec = pltpu.PrefetchScalarGridSpec(
        num_scalar_prefetch=1,             # x_tokens -> SMEM, passed first to kernel
        grid=(1,),                         # single invocation; recurrence is in-kernel
        in_specs=[
            pl.BlockSpec((vocab, 1, hid_dim), lambda i, tok: (0, 0, 0)),
            pl.BlockSpec((hid_dim, hid_dim), lambda i, tok: (0, 0)),
            pl.BlockSpec((hid_dim, out_dim), lambda i, tok: (0, 0)),
            pl.BlockSpec((1, out_dim), lambda i, tok: (0, 0)),
        ],
        out_specs=pl.BlockSpec((batch, out_dim), lambda i, tok: (0, 0)),
    )

    out = pl.pallas_call(
        rnn_fused_kernel,
        out_shape=jax.ShapeDtypeStruct((batch, out_dim), jnp.float32),
        grid_spec=grid_spec,
        compiler_params=pltpu.CompilerParams(
            dimension_semantics=("arbitrary",),
            vmem_limit_bytes=4 * 1024 * 1024,   # working set is ~a few hundred KiB
        ),
        cost_estimate=cost,
    )(x_tokens, proj3, w_hh_f, fc_w_f, fc_b2)
    return out


def reference_forward(x_tokens, emb_table, w_ih, w_hh, bias, fc_w, fc_b):
    """Pure-JAX reference matching PyTorch nn.RNN semantics."""
    embedded = jnp.take(emb_table, x_tokens, axis=0)    # (seq, batch, emb)
    batch = x_tokens.shape[1]
    h = jnp.zeros((batch, w_hh.shape[0]), jnp.float32)

    def step(h, x_t):
        h_new = jnp.tanh(x_t @ w_ih + h @ w_hh + bias)
        return h_new, None

    h_final, _ = lax.scan(step, h, embedded)
    return h_final @ fc_w + fc_b


if __name__ == "__main__":
    # Small shapes consistent with the module's forward:
    #   input_dim (vocab) = 32, embedding_dim = 16, hidden_dim = 32,
    #   output_dim = 8, seq_len = 8, batch = 2
    seq_len, batch = 8, 2
    vocab, emb_dim, hid_dim, out_dim = 32, 16, 32, 8

    key = jax.random.PRNGKey(0)
    k_emb, k_wih, k_whh, k_bih, k_bhh, k_fcw, k_fcb, k_x = jax.random.split(key, 8)

    # Deterministic synthetic parameters (nn.RNN weights stored pre-transposed
    # for right-multiplication: W_ih (E,H), W_hh (H,H), fc_W (H,O)).
    emb_table = 0.1 * jax.random.normal(k_emb, (vocab, emb_dim), jnp.float32)
    w_ih = 0.1 * jax.random.normal(k_wih, (emb_dim, hid_dim), jnp.float32)
    w_hh = 0.1 * jax.random.normal(k_whh, (hid_dim, hid_dim), jnp.float32)
    b_ih = 0.1 * jax.random.normal(k_bih, (1, hid_dim), jnp.float32)
    b_hh = 0.1 * jax.random.normal(k_bhh, (1, hid_dim), jnp.float32)
    bias = b_ih + b_hh                      # combined, as in the RNN cell equation
    fc_w = 0.1 * jax.random.normal(k_fcw, (hid_dim, out_dim), jnp.float32)
    fc_b = 0.1 * jax.random.normal(k_fcb, (1, out_dim), jnp.float32)

    x_tokens = jax.random.randint(k_x, (seq_len, batch), 0, vocab, dtype=jnp.int32)

    out = rnn_forward(x_tokens, emb_table, w_ih, w_hh, bias, fc_w, fc_b)
    out = jax.block_until_ready(out)

    ref = reference_forward(x_tokens, emb_table, w_ih, w_hh, bias, fc_w, fc_b)
    assert out.shape == (batch, out_dim)
    assert np.allclose(np.asarray(out), np.asarray(ref), atol=1e-5, rtol=1e-5)

    print("KERNEL_OK")
</pallas_src>

<mosaic_0001>
module attributes {stable_mosaic.version = 11 : i64} {
  func.func @rnn_fused_kernel(%arg0: i32, %arg1: memref<8x2xi32, #tpu.memory_space<smem>>, %arg2: memref<32x1x32xf32, #tpu.memory_space<vmem>>, %arg3: memref<32x32xf32, #tpu.memory_space<vmem>>, %arg4: memref<32x8xf32, #tpu.memory_space<vmem>>, %arg5: memref<1x8xf32, #tpu.memory_space<vmem>>, %arg6: memref<2x8xf32, #tpu.memory_space<vmem>>) attributes {dimension_semantics = [#tpu.dimension_semantics<arbitrary>], iteration_bounds = array<i64: 1>, scalar_prefetch = 1 : i64, scratch_operands = 0 : i64, tpu.core_type = #tpu.core_type<tc>, window_params = [{pipeline_mode = #tpu.pipeline_mode<synchronous>, transform_indices = @transform_0, window_bounds = array<i64: 32, 1, 32>}, {pipeline_mode = #tpu.pipeline_mode<synchronous>, transform_indices = @transform_1, window_bounds = array<i64: 32, 32>}, {pipeline_mode = #tpu.pipeline_mode<synchronous>, transform_indices = @transform_2, window_bounds = array<i64: 32, 8>}, {pipeline_mode = #tpu.pipeline_mode<synchronous>, transform_indices = @transform_3, window_bounds = array<i64: 1, 8>}, {pipeline_mode = #tpu.pipeline_mode<synchronous>, transform_indices = @transform_4, window_bounds = array<i64: 2, 8>}]} {
    %c0 = arith.constant 0 : index
    %c0_0 = arith.constant 0 : index
    %0 = vector.load %arg3[%c0, %c0_0] : memref<32x32xf32, #tpu.memory_space<vmem>>, vector<32x32xf32>
    %cst = arith.constant 0.000000e+00 : f32
    %1 = vector.broadcast %cst : f32 to vector<2x32xf32>
    %c0_i32 = arith.constant 0 : i32
    %2 = arith.index_cast %c0_i32 : i32 to index
    %c0_1 = arith.constant 0 : index
    %3 = memref.load %arg1[%2, %c0_1] : memref<8x2xi32, #tpu.memory_space<smem>>
    %4 = arith.index_cast %3 : i32 to index
    %c0_2 = arith.constant 0 : index
    %c0_3 = arith.constant 0 : index
    %5 = vector.load %arg2[%4, %c0_2, %c0_3] : memref<32x1x32xf32, #tpu.memory_space<vmem>>, vector<1x1x32xf32>
    %6 = vector.shape_cast %5 : vector<1x1x32xf32> to vector<1x32xf32>
    %7 = arith.index_cast %c0_i32 : i32 to index
    %c1 = arith.constant 1 : index
    %8 = memref.load %arg1[%7, %c1] : memref<8x2xi32, #tpu.memory_space<smem>>
    %9 = arith.index_cast %8 : i32 to index
    %c0_4 = arith.constant 0 : index
    %c0_5 = arith.constant 0 : index
    %10 = vector.load %arg2[%9, %c0_4, %c0_5] : memref<32x1x32xf32, #tpu.memory_space<vmem>>, vector<1x1x32xf32>
    %11 = vector.shape_cast %10 : vector<1x1x32xf32> to vector<1x32xf32>
    %12 = tpu.concatenate %6, %11 in 0 : vector<1x32xf32>, vector<1x32xf32> -> vector<2x32xf32>
    %cst_6 = arith.constant dense<0.000000e+00> : vector<2x32xf32>
    %13 = tpu.matmul %1, %0, %cst_6 {dimension_numbers = #tpu.dot_dimension_numbers<[1], [0], [0], [1], [0, 0, 1, 1], [], []>} : vector<2x32xf32>, vector<32x32xf32>, vector<2x32xf32> -> vector<2x32xf32>
    %14 = arith.addf %12, %13 : vector<2x32xf32>
    %15 = math.tanh %14 : vector<2x32xf32>
    %c1_i32 = arith.constant 1 : i32
    %16 = arith.index_cast %c1_i32 : i32 to index
    %c0_7 = arith.constant 0 : index
    %17 = memref.load %arg1[%16, %c0_7] : memref<8x2xi32, #tpu.memory_space<smem>>
    %18 = arith.index_cast %17 : i32 to index
    %c0_8 = arith.constant 0 : index
    %c0_9 = arith.constant 0 : index
    %19 = vector.load %arg2[%18, %c0_8, %c0_9] : memref<32x1x32xf32, #tpu.memory_space<vmem>>, vector<1x1x32xf32>
    %20 = vector.shape_cast %19 : vector<1x1x32xf32> to vector<1x32xf32>
    %21 = arith.index_cast %c1_i32 : i32 to index
    %c1_10 = arith.constant 1 : index
    %22 = memref.load %arg1[%21, %c1_10] : memref<8x2xi32, #tpu.memory_space<smem>>
    %23 = arith.index_cast %22 : i32 to index
    %c0_11 = arith.constant 0 : index
    %c0_12 = arith.constant 0 : index
    %24 = vector.load %arg2[%23, %c0_11, %c0_12] : memref<32x1x32xf32, #tpu.memory_space<vmem>>, vector<1x1x32xf32>
    %25 = vector.shape_cast %24 : vector<1x1x32xf32> to vector<1x32xf32>
    %26 = tpu.concatenate %20, %25 in 0 : vector<1x32xf32>, vector<1x32xf32> -> vector<2x32xf32>
    %cst_13 = arith.constant dense<0.000000e+00> : vector<2x32xf32>
    %27 = tpu.matmul %15, %0, %cst_13 {dimension_numbers = #tpu.dot_dimension_numbers<[1], [0], [0], [1], [0, 0, 1, 1], [], []>} : vector<2x32xf32>, vector<32x32xf32>, vector<2x32xf32> -> vector<2x32xf32>
    %28 = arith.addf %26, %27 : vector<2x32xf32>
    %29 = math.tanh %28 : vector<2x32xf32>
    %c2_i32 = arith.constant 2 : i32
    %30 = arith.index_cast %c2_i32 : i32 to index
    %c0_14 = arith.constant 0 : index
    %31 = memref.load %arg1[%30, %c0_14] : memref<8x2xi32, #tpu.memory_space<smem>>
    %32 = arith.index_cast %31 : i32 to index
    %c0_15 = arith.constant 0 : index
    %c0_16 = arith.constant 0 : index
    %33 = vector.load %arg2[%32, %c0_15, %c0_16] : memref<32x1x32xf32, #tpu.memory_space<vmem>>, vector<1x1x32xf32>
    %34 = vector.shape_cast %33 : vector<1x1x32xf32> to vector<1x32xf32>
    %35 = arith.index_cast %c2_i32 : i32 to index
    %c1_17 = arith.constant 1 : index
    %36 = memref.load %arg1[%35, %c1_17] : memref<8x2xi32, #tpu.memory_space<smem>>
    %37 = arith.index_cast %36 : i32 to index
    %c0_18 = arith.constant 0 : index
    %c0_19 = arith.constant 0 : index
    %38 = vector.load %arg2[%37, %c0_18, %c0_19] : memref<32x1x32xf32, #tpu.memory_space<vmem>>, vector<1x1x32xf32>
    %39 = vector.shape_cast %38 : vector<1x1x32xf32> to vector<1x32xf32>
    %40 = tpu.concatenate %34, %39 in 0 : vector<1x32xf32>, vector<1x32xf32> -> vector<2x32xf32>
    %cst_20 = arith.constant dense<0.000000e+00> : vector<2x32xf32>
    %41 = tpu.matmul %29, %0, %cst_20 {dimension_numbers = #tpu.dot_dimension_numbers<[1], [0], [0], [1], [0, 0, 1, 1], [], []>} : vector<2x32xf32>, vector<32x32xf32>, vector<2x32xf32> -> vector<2x32xf32>
    %42 = arith.addf %40, %41 : vector<2x32xf32>
    %43 = math.tanh %42 : vector<2x32xf32>
    %c3_i32 = arith.constant 3 : i32
    %44 = arith.index_cast %c3_i32 : i32 to index
    %c0_21 = arith.constant 0 : index
    %45 = memref.load %arg1[%44, %c0_21] : memref<8x2xi32, #tpu.memory_space<smem>>
    %46 = arith.index_cast %45 : i32 to index
    %c0_22 = arith.constant 0 : index
    %c0_23 = arith.constant 0 : index
    %47 = vector.load %arg2[%46, %c0_22, %c0_23] : memref<32x1x32xf32, #tpu.memory_space<vmem>>, vector<1x1x32xf32>
    %48 = vector.shape_cast %47 : vector<1x1x32xf32> to vector<1x32xf32>
    %49 = arith.index_cast %c3_i32 : i32 to index
    %c1_24 = arith.constant 1 : index
    %50 = memref.load %arg1[%49, %c1_24] : memref<8x2xi32, #tpu.memory_space<smem>>
    %51 = arith.index_cast %50 : i32 to index
    %c0_25 = arith.constant 0 : index
    %c0_26 = arith.constant 0 : index
    %52 = vector.load %arg2[%51, %c0_25, %c0_26] : memref<32x1x32xf32, #tpu.memory_space<vmem>>, vector<1x1x32xf32>
    %53 = vector.shape_cast %52 : vector<1x1x32xf32> to vector<1x32xf32>
    %54 = tpu.concatenate %48, %53 in 0 : vector<1x32xf32>, vector<1x32xf32> -> vector<2x32xf32>
    %cst_27 = arith.constant dense<0.000000e+00> : vector<2x32xf32>
    %55 = tpu.matmul %43, %0, %cst_27 {dimension_numbers = #tpu.dot_dimension_numbers<[1], [0], [0], [1], [0, 0, 1, 1], [], []>} : vector<2x32xf32>, vector<32x32xf32>, vector<2x32xf32> -> vector<2x32xf32>
    %56 = arith.addf %54, %55 : vector<2x32xf32>
    %57 = math.tanh %56 : vector<2x32xf32>
    %c4_i32 = arith.constant 4 : i32
    %58 = arith.index_cast %c4_i32 : i32 to index
    %c0_28 = arith.constant 0 : index
    %59 = memref.load %arg1[%58, %c0_28] : memref<8x2xi32, #tpu.memory_space<smem>>
    %60 = arith.index_cast %59 : i32 to index
    %c0_29 = arith.constant 0 : index
    %c0_30 = arith.constant 0 : index
    %61 = vector.load %arg2[%60, %c0_29, %c0_30] : memref<32x1x32xf32, #tpu.memory_space<vmem>>, vector<1x1x32xf32>
    %62 = vector.shape_cast %61 : vector<1x1x32xf32> to vector<1x32xf32>
    %63 = arith.index_cast %c4_i32 : i32 to index
    %c1_31 = arith.constant 1 : index
    %64 = memref.load %arg1[%63, %c1_31] : memref<8x2xi32, #tpu.memory_space<smem>>
    %65 = arith.index_cast %64 : i32 to index
    %c0_32 = arith.constant 0 : index
    %c0_33 = arith.constant 0 : index
    %66 = vector.load %arg2[%65, %c0_32, %c0_33] : memref<32x1x32xf32, #tpu.memory_space<vmem>>, vector<1x1x32xf32>
    %67 = vector.shape_cast %66 : vector<1x1x32xf32> to vector<1x32xf32>
    %68 = tpu.concatenate %62, %67 in 0 : vector<1x32xf32>, vector<1x32xf32> -> vector<2x32xf32>
    %cst_34 = arith.constant dense<0.000000e+00> : vector<2x32xf32>
    %69 = tpu.matmul %57, %0, %cst_34 {dimension_numbers = #tpu.dot_dimension_numbers<[1], [0], [0], [1], [0, 0, 1, 1], [], []>} : vector<2x32xf32>, vector<32x32xf32>, vector<2x32xf32> -> vector<2x32xf32>
    %70 = arith.addf %68, %69 : vector<2x32xf32>
    %71 = math.tanh %70 : vector<2x32xf32>
    %c5_i32 = arith.constant 5 : i32
    %72 = arith.index_cast %c5_i32 : i32 to index
    %c0_35 = arith.constant 0 : index
    %73 = memref.load %arg1[%72, %c0_35] : memref<8x2xi32, #tpu.memory_space<smem>>
    %74 = arith.index_cast %73 : i32 to index
    %c0_36 = arith.constant 0 : index
    %c0_37 = arith.constant 0 : index
    %75 = vector.load %arg2[%74, %c0_36, %c0_37] : memref<32x1x32xf32, #tpu.memory_space<vmem>>, vector<1x1x32xf32>
    %76 = vector.shape_cast %75 : vector<1x1x32xf32> to vector<1x32xf32>
    %77 = arith.index_cast %c5_i32 : i32 to index
    %c1_38 = arith.constant 1 : index
    %78 = memref.load %arg1[%77, %c1_38] : memref<8x2xi32, #tpu.memory_space<smem>>
    %79 = arith.index_cast %78 : i32 to index
    %c0_39 = arith.constant 0 : index
    %c0_40 = arith.constant 0 : index
    %80 = vector.load %arg2[%79, %c0_39, %c0_40] : memref<32x1x32xf32, #tpu.memory_space<vmem>>, vector<1x1x32xf32>
    %81 = vector.shape_cast %80 : vector<1x1x32xf32> to vector<1x32xf32>
    %82 = tpu.concatenate %76, %81 in 0 : vector<1x32xf32>, vector<1x32xf32> -> vector<2x32xf32>
    %cst_41 = arith.constant dense<0.000000e+00> : vector<2x32xf32>
    %83 = tpu.matmul %71, %0, %cst_41 {dimension_numbers = #tpu.dot_dimension_numbers<[1], [0], [0], [1], [0, 0, 1, 1], [], []>} : vector<2x32xf32>, vector<32x32xf32>, vector<2x32xf32> -> vector<2x32xf32>
    %84 = arith.addf %82, %83 : vector<2x32xf32>
    %85 = math.tanh %84 : vector<2x32xf32>
    %c6_i32 = arith.constant 6 : i32
    %86 = arith.index_cast %c6_i32 : i32 to index
    %c0_42 = arith.constant 0 : index
    %87 = memref.load %arg1[%86, %c0_42] : memref<8x2xi32, #tpu.memory_space<smem>>
    %88 = arith.index_cast %87 : i32 to index
    %c0_43 = arith.constant 0 : index
    %c0_44 = arith.constant 0 : index
    %89 = vector.load %arg2[%88, %c0_43, %c0_44] : memref<32x1x32xf32, #tpu.memory_space<vmem>>, vector<1x1x32xf32>
    %90 = vector.shape_cast %89 : vector<1x1x32xf32> to vector<1x32xf32>
    %91 = arith.index_cast %c6_i32 : i32 to index
    %c1_45 = arith.constant 1 : index
    %92 = memref.load %arg1[%91, %c1_45] : memref<8x2xi32, #tpu.memory_space<smem>>
    %93 = arith.index_cast %92 : i32 to index
    %c0_46 = arith.constant 0 : index
    %c0_47 = arith.constant 0 : index
    %94 = vector.load %arg2[%93, %c0_46, %c0_47] : memref<32x1x32xf32, #tpu.memory_space<vmem>>, vector<1x1x32xf32>
    %95 = vector.shape_cast %94 : vector<1x1x32xf32> to vector<1x32xf32>
    %96 = tpu.concatenate %90, %95 in 0 : vector<1x32xf32>, vector<1x32xf32> -> vector<2x32xf32>
    %cst_48 = arith.constant dense<0.000000e+00> : vector<2x32xf32>
    %97 = tpu.matmul %85, %0, %cst_48 {dimension_numbers = #tpu.dot_dimension_numbers<[1], [0], [0], [1], [0, 0, 1, 1], [], []>} : vector<2x32xf32>, vector<32x32xf32>, vector<2x32xf32> -> vector<2x32xf32>
    %98 = arith.addf %96, %97 : vector<2x32xf32>
    %99 = math.tanh %98 : vector<2x32xf32>
    %c7_i32 = arith.constant 7 : i32
    %100 = arith.index_cast %c7_i32 : i32 to index
    %c0_49 = arith.constant 0 : index
    %101 = memref.load %arg1[%100, %c0_49] : memref<8x2xi32, #tpu.memory_space<smem>>
    %102 = arith.index_cast %101 : i32 to index
    %c0_50 = arith.constant 0 : index
    %c0_51 = arith.constant 0 : index
    %103 = vector.load %arg2[%102, %c0_50, %c0_51] : memref<32x1x32xf32, #tpu.memory_space<vmem>>, vector<1x1x32xf32>
    %104 = vector.shape_cast %103 : vector<1x1x32xf32> to vector<1x32xf32>
    %105 = arith.index_cast %c7_i32 : i32 to index
    %c1_52 = arith.constant 1 : index
    %106 = memref.load %arg1[%105, %c1_52] : memref<8x2xi32, #tpu.memory_space<smem>>
    %107 = arith.index_cast %106 : i32 to index
    %c0_53 = arith.constant 0 : index
    %c0_54 = arith.constant 0 : index
    %108 = vector.load %arg2[%107, %c0_53, %c0_54] : memref<32x1x32xf32, #tpu.memory_space<vmem>>, vector<1x1x32xf32>
    %109 = vector.shape_cast %108 : vector<1x1x32xf32> to vector<1x32xf32>
    %110 = tpu.concatenate %104, %109 in 0 : vector<1x32xf32>, vector<1x32xf32> -> vector<2x32xf32>
    %cst_55 = arith.constant dense<0.000000e+00> : vector<2x32xf32>
    %111 = tpu.matmul %99, %0, %cst_55 {dimension_numbers = #tpu.dot_dimension_numbers<[1], [0], [0], [1], [0, 0, 1, 1], [], []>} : vector<2x32xf32>, vector<32x32xf32>, vector<2x32xf32> -> vector<2x32xf32>
    %112 = arith.addf %110, %111 : vector<2x32xf32>
    %113 = math.tanh %112 : vector<2x32xf32>
    %c8_i32 = arith.constant 8 : i32
    %c0_56 = arith.constant 0 : index
    %c0_57 = arith.constant 0 : index
    %114 = vector.load %arg4[%c0_56, %c0_57] : memref<32x8xf32, #tpu.memory_space<vmem>>, vector<32x8xf32>
    %cst_58 = arith.constant dense<0.000000e+00> : vector<2x8xf32>
    %115 = tpu.matmul %113, %114, %cst_58 {dimension_numbers = #tpu.dot_dimension_numbers<[1], [0], [0], [1], [0, 0, 1, 1], [], []>} : vector<2x32xf32>, vector<32x8xf32>, vector<2x8xf32> -> vector<2x8xf32>
    %c0_59 = arith.constant 0 : index
    %c0_60 = arith.constant 0 : index
    %116 = vector.load %arg5[%c0_59, %c0_60] : memref<1x8xf32, #tpu.memory_space<vmem>>, vector<1x8xf32>
    %117 = vector.broadcast %116 : vector<1x8xf32> to vector<2x8xf32>
    %118 = arith.addf %115, %117 : vector<2x8xf32>
    %c0_61 = arith.constant 0 : index
    %c0_62 = arith.constant 0 : index
    %119 = vector.load %arg6[%c0_61, %c0_62] : memref<2x8xf32, #tpu.memory_space<vmem>>, vector<2x8xf32>
    tpu.vector_store %arg6[%c0_61, %c0_62], %118 {strides = array<i32>} : memref<2x8xf32, #tpu.memory_space<vmem>>, vector<2x8xf32>,
    return
  }
  func.func @transform_0(%arg0: i32, %arg1: memref<8x2xi32, #tpu.memory_space<smem>>) -> (i32, i32, i32) {
    %c0_i32 = arith.constant 0 : i32
    %c0_i32_0 = arith.constant 0 : i32
    %c0_i32_1 = arith.constant 0 : i32
    %c0_i32_2 = arith.constant 0 : i32
    return %c0_i32, %c0_i32_0, %c0_i32_1 : i32, i32, i32
  }
  func.func @transform_1(%arg0: i32, %arg1: memref<8x2xi32, #tpu.memory_space<smem>>) -> (i32, i32) {
    %c0_i32 = arith.constant 0 : i32
    %c0_i32_0 = arith.constant 0 : i32
    %c0_i32_1 = arith.constant 0 : i32
    return %c0_i32, %c0_i32_0 : i32, i32
  }
  func.func @transform_2(%arg0: i32, %arg1: memref<8x2xi32, #tpu.memory_space<smem>>) -> (i32, i32) {
    %c0_i32 = arith.constant 0 : i32
    %c0_i32_0 = arith.constant 0 : i32
    %c0_i32_1 = arith.constant 0 : i32
    return %c0_i32, %c0_i32_0 : i32, i32
  }
  func.func @transform_3(%arg0: i32, %arg1: memref<8x2xi32, #tpu.memory_space<smem>>) -> (i32, i32) {
    %c0_i32 = arith.constant 0 : i32
    %c0_i32_0 = arith.constant 0 : i32
    %c0_i32_1 = arith.constant 0 : i32
    return %c0_i32, %c0_i32_0 : i32, i32
  }
  func.func @transform_4(%arg0: i32, %arg1: memref<8x2xi32, #tpu.memory_space<smem>>) -> (i32, i32) {
    %c0_i32 = arith.constant 0 : i32
    %c0_i32_0 = arith.constant 0 : i32
    %c0_i32_1 = arith.constant 0 : i32
    return %c0_i32, %c0_i32_0 : i32, i32
  }
}

</mosaic_0001>

<bundles_post_ra>
// kernel: tpu_custom_call.1
= control target key start
LH: loop header
LB: loop body
LE: loop exit
PB: predicated region body
PF: predicated region fallthrough
CT: control target
= control target key end

     0   :  { %s1383_s0 = inlined_call_operand.vmem [shape: s32[8,2], index: 0, kind: input, shape index: {}]   ;;  %s1384_s1 = inlined_call_operand.vmem [shape: f32[32,1,32], index: 1, kind: input, shape index: {}]   ;;  %s1385_s2 = inlined_call_operand.hbm [shape: f32[32,32], index: 2, kind: input, shape index: {}]   ;;  %s1386_s3 = inlined_call_operand.vmem [shape: f32[32,8], index: 3, kind: input, shape index: {}]   ;;  %s1387_s4 = inlined_call_operand.vmem [shape: f32[1,8], index: 4, kind: input, shape index: {}]   ;;  %s1388_s5 = inlined_call_operand.hbm [shape: f32[2,8], index: 5, kind: output, shape index: {}]  }
   0x1   :  { %s10_s20 = sshll.u32 %s1383_s0, 4  ;;  %s11_s20 = int_to_ptr.vmem [resolvable:$true] %s10_s20 }
   0x2   :  { %s1120_s21 = scalar_lea.vmem %s11_s20, 128  ;;  %p1125_p1 = scmp.lt.s32.totalorder %s11_s20, %s11_s20 }
   0x3   :  { %p1121_p0 = scmp.ne.s32.totalorder %s11_s20, %s1120_s21  ;;  %p1126_p2 = scmp.lt.s32.totalorder %s1120_s21, %s1120_s21 }
   0x5   :  { %p1127_p3 = por %p1126_p2, %p1125_p1 }
   0x7   :  { %p1128_p4 = pnand %p1127_p3, %p1121_p0 }
   0x9   :  { %1131 = shalt.err (!%p1128_p4)  }
   0xa   :  { %s1182_s22 = smov [#allocation3]  }
   0xb   :  { %13 = dma.vmem_to_smem %s11_s20, 128, %s1182_s22, [#allocation2] }
   0xc   :  { %1176 = dma.done.wait [#allocation2], 128 }
   0xd   :  { %1177 = vsyncadd [#allocation2], 4294967168 }
   0xe   :  { %15 = sfence }
   0xf   :  { %16 = vsyncpa [#allocation5], 0 }
  0x10   :  { %17 = vsyncpa [#allocation6], 0  ;;  %s1183_s23 = smov [#allocation4]   ;;  %s1132_s26 = scalar_lea.hbm %s1385_s2, 512 }
  0x11   :  { %s25_s24 = sshll.u32 %s1183_s23, 4  ;;  %p1133_p5 = scmp.ne.s32.totalorder %s1385_s2, %s1132_s26  ;;  %s26_s24 = int_to_ptr.vmem [resolvable:$true] %s25_s24 }
  0x12   :  { %p1136_p6 = scmp.lt.u32.totalorder %s1132_s26, %s1385_s2 }
  0x14   :  { %p1138_p7 = pnand %p1136_p6, %p1133_p5 }
  0x16   :  { %1141 = shalt.err (!%p1138_p7)
}
  0x17   :  { %s1142_s6 = scalar_lea.vmem %s26_s24, 512  ;;  %p1147_p9 = scmp.lt.s32.totalorder %s26_s24, %s26_s24 }
  0x18   :  { %p1143_p8 = scmp.ne.s32.totalorder %s26_s24, %s1142_s6  ;;  %p1148_p10 = scmp.lt.s32.totalorder %s1142_s6, %s1142_s6 }
  0x1a   :  { %p1149_p11 = por %p1148_p10, %p1147_p9 }
  0x1c   :  { %p1150_p12 = pnand %p1149_p11, %p1143_p8 }
  0x1e   :  { %1153 = shalt.err (!%p1150_p12)
}
  0x1f   :  { %s1184_s7 = smov 128   ;;  %s1185_s8 = smov 8  }
  0x20   :  { %31 = dma.hbm_to_vmem [thread:$0]  %s1385_s2, 512, %s26_s24, [#allocation5], %s1184_s7, %s1184_s7, %s1185_s8  }
  0x21   :  { %1178 = dma.done.wait [#allocation5], 512  }
  0x22   :  { %1179 = vsyncadd [#allocation5], 4294966784  ;;  %v1186_v0 = vmov 0.0|0.0   ;;  %vm1187_vm0 = vmmov 0   ;;  %v1188_v1 = vmov 0.0   ;;  %v39_v2 = vld [vmem:[#allocation4] sm:$0xff] }
  0x23   :  { %1042 = vmatprep.subr.bf16.mxu0 %v1186_v0  ;;  %951 = vmatprep.mubr.msk.f32.mxu0 %vm1187_vm0, %v1188_v1  ;;  %v40_v3 = vld [vmem:[#allocation4 + $0x8] sm:$0xff]  ;;  %v41_v4 = vld [vmem:[#allocation4 + $0x10] sm:$0xff]  ;;  %v42_v6 = vld [vmem:[#allocation4 + $0x18] sm:$0xff]  ;;  %s43_s2 = sld [smem:[#allocation3]]  ;;  %s866_s11 = sld [smem:[#allocation3 + $0x1]]  ;;  %vm55_vm1 = vcmask 1040384  }
  0x24   :  { %1048 = vmatprep.subr.bf16.mxu1 %v1186_v0  ;;  %962 = vmatprep.mubr.msk.f32.mxu1 %vm1187_vm0, %v1188_v1  ;;  %v1241_v5 = vpack.c.bf16 %v40_v3, %v39_v2  ;;  %v1244_v7 = vpack.c.bf16 %v42_v6, %v41_v4  ;;  %vm57_vm2 = vcmask 261120   ;;  %s868_s18 = sld [smem:[#allocation3 + $0x80]]  ;;  %s869_s19 = sld [smem:[#allocation3 + $0x81]]  ;;  %v749_v57 = vld [vmem:[%s1386_s3] sm:$0xff]  ;;  %v750_v58 = vld [vmem:[%s1386_s3 + $0x8] sm:$0xff]  ;;  %v751_v59 = vld [vmem:[%s1386_s3 + $0x10] sm:$0xff] }
  0x25   :  { %s872_s0 = sld [smem:[#allocation3 + $0x100]]  ;;  %s873_s26 = sld [smem:[#allocation3 + $0x101]]  ;;  %v1091_v60 = vpack.c.bf16 %v750_v58, %v749_v57  ;;  %v752_v61 = vld [vmem:[%s1386_s3 + $0x18] sm:$0xff]  ;;  %v896_v6 = vld [vmem:[%s1387_s4] ss:$0 sm:$0xff]  ;;  %vm833_vm3 = vcmask 58368  }
  0x26   :  { %1044 = vmatpush3.bf16.msra.mxu0 %v1241_v5  ;;  %1050 = vmatpush3.bf16.msra.mxu1 %v1241_v5  ;;  %s876_s8 = sld [smem:[#allocation3 + $0x180]]  ;;  %s877_s9 = sld [smem:[#allocation3 + $0x181]]  ;;  %v1094_v62 = vpack.c.bf16 %v752_v61, %v751_v59 }
  0x27   :  { %1045 = vmatprep.subr.bf16.mxu0 %v1186_v0  ;;  %1051 = vmatprep.subr.bf16.mxu1 %v1186_v0  ;;  %s880_s15 = sld [smem:[#allocation3 + $0x200]]  ;;  %s881_s16 = sld [smem:[#allocation3 + $0x201]] }
  0x28   :  { %s884_s23 = sld [smem:[#allocation3 + $0x280]]  ;;  %s885_s24 = sld [smem:[#allocation3 + $0x281]] }
  0x29   :  { %s44_s14 = scalar_lea.vmem %s1384_s1, %s43_s2  ;;  %s47_s17 = scalar_lea.vmem %s1384_s1, %s866_s11 }
  0x2a   :  { %1047 = vmatpush3.bf16.msra.mxu0 %v1244_v7  ;;  %1053 = vmatpush3.bf16.msra.mxu1 %v1244_v7  ;;  %v45_v8 = vld [vmem:[%s44_s14] sm:$0x1]  ;;  %s134_s22 = scalar_lea.vmem %s1384_s1, %s868_s18  ;;  %s137_s25 = scalar_lea.vmem %s1384_s1, %s869_s19 }
  0x2b   :  { %1054 = vmatprep.subr.bf16.mxu0 %v1186_v0  ;;  %1060 = vmatprep.subr.bf16.mxu1 %v1186_v0  ;;  %v867_v9 = vld [vmem:[%s47_s17] ss:$0 sm:$0xff]  ;;  %s222_s29 = scalar_lea.vmem %s1384_s1, %s872_s0  ;;  %s225_s7 = scalar_lea.vmem %s1384_s1, %s873_s26 }
  0x2c   :  { %v56_v10 = vsel %vm55_vm1, %v45_v8, %v867_v9  ;;  %v135_v15 = vld [vmem:[%s134_s22] sm:$0x1]  ;;  %s310_s11 = scalar_lea.vmem %s1384_s1, %s876_s8  ;;  %s313_s14 = scalar_lea.vmem %s1384_s1, %s877_s9 }
  0x2d   :  { %952 = vmatmul.mubr.f32.vlgmr.msra.gmra.mrb[0].mxu0 %v1188_v1  ;;  %v870_v16 = vld [vmem:[%s137_s25] ss:$0 sm:$0xff]  ;;  %s398_s19 = scalar_lea.vmem %s1384_s1, %s880_s15  ;;  %s401_s22 = scalar_lea.vmem %s1384_s1, %s881_s16 }
  0x2e   :  { %1056 = vmatpush3.bf16.msra.mxu0 %v1241_v5  ;;  %973 = vmatprep.mubr.msk.f32.mxu0 %vm1187_vm0, %v1188_v1  ;;  %v145_v17 = vsel %vm55_vm1, %v135_v15, %v870_v16  ;;  %v223_v22 = vld [vmem:[%s222_s29] sm:$0x1]  ;;  %s486_s26 = scalar_lea.vmem %s1384_s1, %s884_s23  ;;  %s489_s29 = scalar_lea.vmem %s1384_s1, %s885_s24 }
  0x2f   :  { %1057 = vmatprep.subr.bf16.mxu0 %v1186_v0  ;;  %v874_v23 = vld [vmem:[%s225_s7] ss:$0 sm:$0xff]  ;;  %s888_s30 = sld [smem:[#allocation3 + $0x300]]  ;;  %s889_s6 = sld [smem:[#allocation3 + $0x301]] }
  0x30   :  { %v233_v24 = vsel %vm55_vm1, %v223_v22, %v874_v23  ;;  %v311_v29 = vld [vmem:[%s310_s11] sm:$0x1]  ;;  %s892_s20 = sld [smem:[#allocation3 + $0x380]]  ;;  %s893_s21 = sld [smem:[#allocation3 + $0x381]] }
  0x31   :  { %v878_v30 = vld [vmem:[%s313_s14] ss:$0 sm:$0xff]  ;;  %s1189_s28 = smov [#allocation7]  }
  0x32   :  { %1059 = vmatpush3.bf16.msra.mxu0 %v1244_v7  ;;  %v321_v31 = vsel %vm55_vm1, %v311_v29, %v878_v30  ;;  %v399_v36 = vld [vmem:[%s398_s19] sm:$0x1] }
  0x33   :  { %1066 = vmatprep.subr.bf16.mxu0 %v1186_v0  ;;  %v882_v37 = vld [vmem:[%s401_s22] ss:$0 sm:$0xff] }
  0x34   :  { %v409_v38 = vsel %vm55_vm1, %v399_v36, %v882_v37  ;;  %v487_v43 = vld [vmem:[%s486_s26] sm:$0x1] }
  0x35   :  { %v886_v44 = vld [vmem:[%s489_s29] ss:$0 sm:$0xff]  ;;  %s574_s9 = scalar_lea.vmem %s1384_s1, %s888_s30  ;;  %s577_s11 = scalar_lea.vmem %s1384_s1, %s889_s6 }
  0x36   :  { %v497_v45 = vsel %vm55_vm1, %v487_v43, %v886_v44  ;;  %v575_v50 = vld [vmem:[%s574_s9] sm:$0x1]  ;;  %s662_s24 = scalar_lea.vmem %s1384_s1, %s892_s20  ;;  %s665_s26 = scalar_lea.vmem %s1384_s1, %s893_s21 }
  0x37   :  { %v890_v51 = vld [vmem:[%s577_s11] ss:$0 sm:$0xff]  ;;  %s841_s29 = sshll.u32 %s1189_s28, 4  ;;  %s842_s29 = int_to_ptr.vmem [resolvable:$true] %s841_s29 }
  0x38   :  { %v585_v52 = vsel %vm55_vm1, %v575_v50, %v890_v51  ;;  %v663_v63 = vld [vmem:[%s662_s24] sm:$0x1]  ;;  %s1154_s1 = scalar_lea.vmem %s842_s29, 32  ;;  %p1159_p0 = scmp.lt.s32.totalorder %s842_s29, %s842_s29 }
  0x39   :  { %p1155_p13 = scmp.ne.s32.totalorder %s842_s29, %s1154_s1  ;;  %p1160_p1 = scmp.lt.s32.totalorder %s1154_s1, %s1154_s1 }
  0x3b   :  { %p1161_p2 = por %p1160_p1, %p1159_p0 }
  0x3d   :  { %p1162_p3 = pnand %p1161_p2, %p1155_p13 }
 0x100   :  { %v127_v11 = vpop.f32.mrb[0].mxu0 }
 0x101   :  { %v131_v12 = vadd.f32 %v127_v11, %v56_v10  ;;  %v953_v13 = vpop.f32.mrb[1].mxu0 }
 0x103   :  { %1104 = vtanh.f32 %v131_v12 }
 0x10d   :  { %v1105_v14 = vpop.eup %1104 }
 0x10e   :  { %963 = vmatmul.mubr.msk.f32.vlgmr.msra.gmra.mrb[0].mxu1 %vm57_vm2, %v1105_v14 }
 0x10f   :  { %1062 = vmatpush3.bf16.msra.mxu1 %v1241_v5  ;;  %984 = vmatprep.mubr.msk.f32.mxu1 %vm1187_vm0, %v1188_v1 }
 0x110   :  { %1063 = vmatprep.subr.bf16.mxu1 %v1186_v0 }
 0x113   :  { %1065 = vmatpush3.bf16.msra.mxu1 %v1244_v7 }
 0x114   :  { %1072 = vmatprep.subr.bf16.mxu1 %v1186_v0 }
 0x1e1   :  { %v215_v18 = vpop.f32.mrb[0].mxu1 }
 0x1e2   :  { %v219_v19 = vadd.f32 %v215_v18, %v145_v17  ;;  %v964_v20 = vpop.f32.mrb[1].mxu1 }
 0x1e4   :  { %1106 = vtanh.f32 %v219_v19 }
 0x1ee   :  { %v1107_v21 = vpop.eup %1106 }
 0x1ef   :  { %974 = vmatmul.mubr.msk.f32.vlgmr.msra.gmra.mrb[2].mxu0 %vm57_vm2, %v1107_v21 }
 0x1f0   :  { %1068 = vmatpush3.bf16.msra.mxu0 %v1241_v5  ;;  %995 = vmatprep.mubr.msk.f32.mxu0 %vm1187_vm0, %v1188_v1 }
 0x1f1   :  { %1069 = vmatprep.subr.bf16.mxu0 %v1186_v0 }
 0x1f4   :  { %1071 = vmatpush3.bf16.msra.mxu0 %v1244_v7 }
 0x1f5   :  { %1078 = vmatprep.subr.bf16.mxu0 %v1186_v0 }
 0x2c2   :  { %v303_v25 = vpop.f32.mrb[2].mxu0 }
 0x2c3   :  { %v307_v26 = vadd.f32 %v303_v25, %v233_v24  ;;  %v975_v27 = vpop.f32.mrb[3].mxu0 }
 0x2c5   :  { %1108 = vtanh.f32 %v307_v26 }
 0x2cf   :  { %v1109_v28 = vpop.eup %1108 }
 0x2d0   :  { %985 = vmatmul.mubr.msk.f32.vlgmr.msra.gmra.mrb[2].mxu1 %vm57_vm2, %v1109_v28 }
 0x2d1   :  { %1074 = vmatpush3.bf16.msra.mxu1 %v1241_v5  ;;  %1006 = vmatprep.mubr.msk.f32.mxu1 %vm1187_vm0, %v1188_v1 }
 0x2d2   :  { %1075 = vmatprep.subr.bf16.mxu1 %v1186_v0 }
 0x2d5   :  { %1077 = vmatpush3.bf16.msra.mxu1 %v1244_v7 }
 0x2d6   :  { %1084 = vmatprep.subr.bf16.mxu1 %v1186_v0 }
 0x3a3   :  { %v391_v32 = vpop.f32.mrb[2].mxu1 }
 0x3a4   :  { %v395_v33 = vadd.f32 %v391_v32, %v321_v31  ;;  %v986_v34 = vpop.f32.mrb[3].mxu1 }
 0x3a6   :  { %1110 = vtanh.f32 %v395_v33 }
 0x3b0   :  { %v1111_v35 = vpop.eup %1110 }
 0x3b1   :  { %996 = vmatmul.mubr.msk.f32.vlgmr.msra.gmra.mrb[4].mxu0 %vm57_vm2, %v1111_v35 }
 0x3b2   :  { %1080 = vmatpush3.bf16.msra.mxu0 %v1241_v5  ;;  %1017 = vmatprep.mubr.msk.f32.mxu0 %vm1187_vm0, %v1188_v1 }
 0x3b3   :  { %1081 = vmatprep.subr.bf16.mxu0 %v1186_v0 }
 0x3b6   :  { %1083 = vmatpush3.bf16.msra.mxu0 %v1244_v7 }
 0x3b7   :  { %1090 = vmatprep.subr.bf16.mxu0 %v1186_v0 }
 0x484   :  { %v479_v39 = vpop.f32.mrb[4].mxu0 }
 0x485   :  { %v483_v40 = vadd.f32 %v479_v39, %v409_v38  ;;  %v997_v41 = vpop.f32.mrb[5].mxu0 }
 0x487   :  { %1112 = vtanh.f32 %v483_v40 }
 0x491   :  { %v1113_v42 = vpop.eup %1112 }
 0x492   :  { %1007 = vmatmul.mubr.msk.f32.vlgmr.msra.gmra.mrb[4].mxu1 %vm57_vm2, %v1113_v42 }
 0x493   :  { %1086 = vmatpush3.bf16.msra.mxu1 %v1241_v5  ;;  %1028 = vmatprep.mubr.msk.f32.mxu1 %vm1187_vm0, %v1188_v1 }
 0x494   :  { %1087 = vmatprep.subr.bf16.mxu1 %v1186_v0 }
 0x497   :  { %1089 = vmatpush3.bf16.msra.mxu1 %v1244_v7 }
 0x565   :  { %v567_v46 = vpop.f32.mrb[4].mxu1 }
 0x566   :  { %v571_v47 = vadd.f32 %v567_v46, %v497_v45  ;;  %v1008_v48 = vpop.f32.mrb[5].mxu1 }
 0x568   :  { %1114 = vtanh.f32 %v571_v47 }
 0x572   :  { %v1115_v49 = vpop.eup %1114 }
 0x573   :  { %1018 = vmatmul.mubr.msk.f32.vlgmr.msra.gmra.mrb[6].mxu0 %vm57_vm2, %v1115_v49 }
 0x574   :  { %1039 = vmatprep.mubr.msk.f32.mxu0 %vm1187_vm0, %v1188_v1  ;;  %1092 = vmatpush3.bf16.msra.mxu0 %v1091_v60  ;;  %v894_v1 = vld [vmem:[%s665_s26] ss:$0 sm:$0xff] }
 0x575   :  { %1093 = vmatprep.subr.bf16.mxu0 %v1186_v0  ;;  %v673_v2 = vsel %vm55_vm1, %v663_v63, %v894_v1 }
 0x578   :  { %1095 = vmatpush3.bf16.msra.mxu0 %v1094_v62 }
 0x646   :  { %v655_v53 = vpop.f32.mrb[6].mxu0 }
 0x647   :  { %v659_v54 = vadd.f32 %v655_v53, %v585_v52  ;;  %v1019_v55 = vpop.f32.mrb[7].mxu0 }
 0x649   :  { %1116 = vtanh.f32 %v659_v54 }
 0x653   :  { %v1117_v56 = vpop.eup %1116 }
 0x654   :  { %1029 = vmatmul.mubr.msk.f32.vlgmr.msra.gmra.mrb[6].mxu1 %vm57_vm2, %v1117_v56 }
 0x727   :  { %v743_v3 = vpop.f32.mrb[6].mxu1 }
 0x728   :  { %v747_v4 = vadd.f32 %v743_v3, %v673_v2  ;;  %v1030_v5 = vpop.f32.mrb[7].mxu1 }
 0x72a   :  { %1118 = vtanh.f32 %v747_v4 }
 0x734   :  { %v1119_v0 = vpop.eup %1118 }
 0x735   :  { %1040 = vmatmul.mubr.msk.f32.vlgmr.msra.gmra.mrb[8].mxu0 %vm57_vm2, %v1119_v0 }
 0x808   :  { %v829_v7 = vpop.f32.mrb[8].mxu0 }
 0x809   :  { %v830_v8 = vadd.f32 %v896_v6, %v829_v7  ;;  %v1041_v9 = vpop.f32.mrb[9].mxu0 }
 0x80b   :  { %834 = vst.msk [vmem:[#allocation7] sm:$0x3] %vm833_vm3, %v830_v8 }
 0x80c   :  { %1165 = shalt.err (!%p1162_p3)
}
 0x80d   :  { %s1166_s7 = scalar_lea.hbm %s1388_s5, 32 }
 0x80e   :  { %p1167_p4 = scmp.ne.s32.totalorder %s1388_s5, %s1166_s7  ;;  %p1170_p5 = scmp.lt.u32.totalorder %s1166_s7, %s1388_s5 }
 0x810   :  { %p1172_p6 = pnand %p1170_p5, %p1167_p4 }
 0x812   :  { %1175 = shalt.err (!%p1172_p6)
}
 0x813   :  { %844 = dma.vmem_to_hbm [thread:$0]  %s842_s29, 32, %s1388_s5, [#allocation6]  }
 0x814   :  { %1180 = dma.done.wait [#allocation6], 32  }
 0x815   :  { %1181 = vsyncadd [#allocation6], 4294967264 }
 0x816   :  { %848 = vsyncpa [#allocation5], 1 }
 0x817   :  { %849 = vsyncpa [#allocation6], 1 }

</bundles_post_ra>
